<compile_context>
chip_gen: v7x
topology: tpu7x:2x2x1
jax: 0.10.0
libtpu: 0.0.40
codegen_flags: <defaults>
</compile_context>

<pallas_src>
import functools

import jax
import jax.numpy as jnp
from jax import lax
from jax.experimental import pallas as pl
from jax.experimental.pallas import tpu as pltpu


def _round_up(x, m):
    return ((x + m - 1) // m) * m


def pinn_mlp_kernel(x_ref, w_in_ref, b_in_ref, w_h_ref, b_h_ref,
                    w_out_ref, b_out_ref, o_ref, *, use_bf16=False):
    """One batch tile of the (lane-packed) PINN MLP.

    Shapes (packed): x (tp, n_in_p), w_in (n_in_p, n_hid_p), b_in (1, n_hid_p),
    w_h (n_hl, n_hid_p, n_hid_p), b_h (n_hl, 1, n_hid_p), w_out (n_hid_p, n_out_p),
    b_out (1, n_out_p), o (tp, n_out_p).
    """
    x = x_ref[...]                      # (tp, n_in_p)
    w_in = w_in_ref[...]                # (n_in_p, n_hid_p)
    n_in_p = w_in.shape[0]              # static

    # First layer on the VPU: K = n_in_p (2-8) would run the MXU at ~1-3% utilization
    # and occupy the vector-extended (matmul push) slot. A handful of broadcast FMAs
    # per vreg is cheaper and leaves the MXU free for the hidden/output layers.
    h = b_in_ref[...] + x[:, 0:1] * w_in[0:1, :]
    for j in range(1, n_in_p):
        h = h + x[:, j:j + 1] * w_in[j:j + 1, :]
    h = jnp.tanh(h)                     # (tp, n_hid_p) f32

    cdt = jnp.bfloat16 if use_bf16 else jnp.float32

    # Hidden stack: (N_FLAYERS - 1) x [Linear(H, H) + tanh], block-diag packed weights.
    n_hl = w_h_ref.shape[0]
    if n_hl <= 8:
        # Shallow: static unroll.
        for l in range(n_hl):
            h = jnp.tanh(
                jnp.dot(h.astype(cdt), w_h_ref[l].astype(cdt),
                        preferred_element_type=jnp.float32)
                + b_h_ref[l])
    else:
        # Deep: bounded unroll keeps code size / scheduler pressure in check.
        def body(l, h):
            return jnp.tanh(
                jnp.dot(h.astype(cdt), w_h_ref[l].astype(cdt),
                        preferred_element_type=jnp.float32)
                + b_h_ref[l])
        h = lax.fori_loop(0, n_hl, body, h, unroll=4)

    # Output layer: Linear(H, n_out) (no activation).
    o_ref[...] = (
        jnp.dot(h.astype(cdt), w_out_ref[...].astype(cdt),
                preferred_element_type=jnp.float32)
        + b_out_ref[...]
    ).astype(o_ref.dtype)
    # TODO(synk): if profiling shows masked stores binding, present a lane-dense
    # (b_pad/64, 128) output slab instead of (tp, n_out_p); secondary, measured-only.


def pinn_forward(x, w_in, b_in, w_h, b_h, w_out, b_out, *, tb=8192,
                 use_bf16=False, vmem_limit_bytes=None):
    """Forward pass of the PINN MLP. x: (B, n_in) f32 -> (B, n_out) f32."""
    B, n_in = x.shape
    n_hidden = w_in.shape[1]
    n_out = w_out.shape[1]
    n_hl = w_h.shape[0]

    # ---- lane packing factor: fill the 128-lane axis with `pack` batch rows ----
    pack = max(1, 128 // n_hidden)
    n_in_p, n_hid_p, n_out_p = pack * n_in, pack * n_hidden, pack * n_out

    # Block-diagonal weights / lane-tiled biases (pure wrapper-side prep; under jit
    # this is constant-folded — in a training loop you would pack once outside).
    eye = jnp.eye(pack, dtype=jnp.float32)
    w_in_p = jnp.kron(eye, w_in)                        # (n_in_p, n_hid_p)
    b_in_p = jnp.tile(b_in, (1, pack))                  # (1, n_hid_p)
    w_h_p = jax.vmap(lambda w: jnp.kron(eye, w))(w_h)   # (n_hl, n_hid_p, n_hid_p)
    b_h_p = jnp.tile(b_h, (1, 1, pack))                 # (n_hl, 1, n_hid_p)
    w_out_p = jnp.kron(eye, w_out)                      # (n_hid_p, n_out_p)
    b_out_p = jnp.tile(b_out, (1, pack))                # (1, n_out_p)

    # ---- batch tiling: packed rows must be sublane-aligned (multiple of 8) ----
    align = 8 * pack
    b_al = _round_up(B, align)
    # Aim for >= 2 grid steps whenever the batch permits, so the "parallel" batch
    # axis shards across both TensorCores on v7x.
    tb_cap = _round_up(pl.cdiv(b_al, 2), align) if b_al >= 2 * align else b_al
    tb_eff = max(align, min(_round_up(tb, align), tb_cap))
    b_pad = _round_up(B, tb_eff)
    grid = (b_pad // tb_eff,)
    tp = tb_eff // pack                                  # packed rows per tile

    x_p = jnp.pad(x, ((0, b_pad - B), (0, 0))) if b_pad != B else x
    x_packed = x_p.reshape(b_pad // pack, n_in_p)        # pure row-major reshape

    # ---- explicit VMEM budget (lane-padded tiles, double-buffered IO) ----
    def lane_pad(n):
        return _round_up(n, 128)
    in_tile_bytes = tp * lane_pad(n_in_p) * 4
    out_tile_bytes = tp * lane_pad(n_out_p) * 4
    act_tile_bytes = tp * lane_pad(n_hid_p) * 4
    weight_bytes = 4 * (n_in_p * n_hid_p + n_hid_p
                        + n_hl * (n_hid_p * n_hid_p + n_hid_p)
                        + n_hid_p * n_out_p + n_out_p)
    vmem_needed = (2 * in_tile_bytes + 2 * out_tile_bytes
                   + 3 * act_tile_bytes + 2 * weight_bytes)
    if vmem_limit_bytes is None:
        # >= 16 MiB so large tiles also compile on v5e (default scoped VMEM 16 MiB),
        # <= 48 MiB so we keep headroom under v7x's 64 MiB physical VMEM.
        vmem_limit_bytes = int(min(48 << 20, max(16 << 20, 2 * vmem_needed)))

    # ---- advisory cost estimate (packed op counts) for XLA's scheduler ----
    bp = b_pad // pack
    flops = 2 * bp * (n_in_p * n_hid_p + n_hl * n_hid_p * n_hid_p + n_hid_p * n_out_p)
    transcendentals = bp * n_hid_p * (n_hl + 1)
    bytes_accessed = 4 * bp * (n_in_p + n_out_p) + weight_bytes

    kernel = functools.partial(pinn_mlp_kernel, use_bf16=use_bf16)

    out_packed = pl.pallas_call(
        kernel,
        out_shape=jax.ShapeDtypeStruct((b_pad // pack, n_out_p), jnp.float32),
        grid_spec=pltpu.PrefetchScalarGridSpec(
            num_scalar_prefetch=0,
            grid=grid,
            in_specs=[
                # activations: streamed over the batch grid
                pl.BlockSpec((tp, n_in_p), lambda i: (i, 0)),
                # parameters: full arrays, resident across the grid
                pl.BlockSpec((n_in_p, n_hid_p), lambda i: (0, 0)),
                pl.BlockSpec((1, n_hid_p), lambda i: (0, 0)),
                pl.BlockSpec((n_hl, n_hid_p, n_hid_p), lambda i: (0, 0, 0)),
                pl.BlockSpec((n_hl, 1, n_hid_p), lambda i: (0, 0, 0)),
                pl.BlockSpec((n_hid_p, n_out_p), lambda i: (0, 0)),
                pl.BlockSpec((1, n_out_p), lambda i: (0, 0)),
            ],
            out_specs=pl.BlockSpec((tp, n_out_p), lambda i: (i, 0)),
        ),
        compiler_params=pltpu.CompilerParams(
            dimension_semantics=("parallel",),
            vmem_limit_bytes=vmem_limit_bytes,
        ),
        cost_estimate=pl.CostEstimate(
            flops=flops,
            transcendentals=transcendentals,
            bytes_accessed=bytes_accessed,
        ),
    )(x_packed, w_in_p, b_in_p, w_h_p, b_h_p, w_out_p, b_out_p)

    out = out_packed.reshape(b_pad, n_out)   # undo the lane packing (row-major)
    return out[:B] if b_pad != B else out


def init_pinn_params(key, n_input, n_output, n_hidden, n_flayers):
    """Init mimicking PyTorch Linear's U(-1/sqrt(fan_in), 1/sqrt(fan_in)).

    Weights are returned already transposed to (in, out) for the kernel.
    """
    keys = jax.random.split(key, 6)

    def uniform(k, shape, fan_in):
        bound = 1.0 / jnp.sqrt(jnp.asarray(fan_in, jnp.float32))
        return jax.random.uniform(k, shape, jnp.float32, -bound, bound)

    w_in = uniform(keys[0], (n_input, n_hidden), n_input)
    b_in = uniform(keys[1], (1, n_hidden), n_input)

    n_hl = n_flayers - 1
    w_h = uniform(keys[2], (n_hl, n_hidden, n_hidden), n_hidden)
    b_h = uniform(keys[3], (n_hl, 1, n_hidden), n_hidden)

    w_out = uniform(keys[4], (n_hidden, n_output), n_hidden)
    b_out = uniform(keys[5], (1, n_output), n_hidden)
    return w_in, b_in, w_h, b_h, w_out, b_out


def pinn_forward_ref(x, w_in, b_in, w_h, b_h, w_out, b_out):
    h = jnp.tanh(x @ w_in + b_in)
    for l in range(w_h.shape[0]):
        h = jnp.tanh(h @ w_h[l] + b_h[l])
    return h @ w_out + b_out


# TODO(synk): the PyTorch module's train() method (Adam loop + user-supplied PDE/data/
# condition losses via autograd) is a host-side training loop, not part of forward();
# it is intentionally not translated to Pallas.

if __name__ == "__main__":
    # PINN-like shapes: N_INPUT=2, N_OUTPUT=2, N_HIDDEN=32, N_FLAYERS=3.
    N_INPUT, N_OUTPUT, N_HIDDEN, N_FLAYERS = 2, 2, 32, 3

    key = jax.random.PRNGKey(0)
    kx, kp, kx2, kp2 = jax.random.split(key, 4)

    params = init_pinn_params(kp, N_INPUT, N_OUTPUT, N_HIDDEN, N_FLAYERS)

    # Small batch: exercises lane packing + >=2-step (dual-TC friendly) grid.
    x = jax.random.normal(kx, (64, N_INPUT), dtype=jnp.float32)
    out = jax.block_until_ready(pinn_forward(x, *params))
    ref = pinn_forward_ref(x, *params)
    assert out.shape == (64, N_OUTPUT)
    assert jnp.allclose(out, ref, atol=1e-5, rtol=1e-4), "mismatch vs reference (small)"

    # Batch not a multiple of the pack factor / tile: wrapper padding + multi-tile grid.
    x2 = jax.random.normal(kx2, (999, N_INPUT), dtype=jnp.float32)
    out2 = jax.block_until_ready(pinn_forward(x2, *params, tb=512))
    ref2 = pinn_forward_ref(x2, *params)
    assert out2.shape == (999, N_OUTPUT)
    assert jnp.allclose(out2, ref2, atol=1e-5, rtol=1e-4), "mismatch vs reference (padded)"

    # Deep hidden stack (n_hl = 9 > 8): exercises the bounded-unroll fori_loop path.
    params_deep = init_pinn_params(kp2, N_INPUT, N_OUTPUT, N_HIDDEN, 10)
    out3 = jax.block_until_ready(pinn_forward(x, *params_deep))
    ref3 = pinn_forward_ref(x, *params_deep)
    assert jnp.allclose(out3, ref3, atol=1e-5, rtol=1e-4), "mismatch vs reference (deep)"

    print("KERNEL_OK")
</pallas_src>

<mosaic_0001>
module attributes {stable_mosaic.version = 11 : i64} {
  func.func @pinn_mlp_kernel(%arg0: i32, %arg1: memref<8x8xf32, #tpu.memory_space<vmem>>, %arg2: memref<8x128xf32, #tpu.memory_space<vmem>>, %arg3: memref<1x128xf32, #tpu.memory_space<vmem>>, %arg4: memref<2x128x128xf32, #tpu.memory_space<vmem>>, %arg5: memref<2x1x128xf32, #tpu.memory_space<vmem>>, %arg6: memref<128x8xf32, #tpu.memory_space<vmem>>, %arg7: memref<1x8xf32, #tpu.memory_space<vmem>>, %arg8: memref<8x8xf32, #tpu.memory_space<vmem>>) attributes {dimension_semantics = [#tpu.dimension_semantics<parallel>], iteration_bounds = array<i64: 2>, scalar_prefetch = 0 : i64, scratch_operands = 0 : i64, tpu.core_type = #tpu.core_type<tc>, window_params = [{transform_indices = @transform_0, window_bounds = array<i64: 8, 8>}, {pipeline_mode = #tpu.pipeline_mode<synchronous>, transform_indices = @transform_1, window_bounds = array<i64: 8, 128>}, {pipeline_mode = #tpu.pipeline_mode<synchronous>, transform_indices = @transform_2, window_bounds = array<i64: 1, 128>}, {pipeline_mode = #tpu.pipeline_mode<synchronous>, transform_indices = @transform_3, window_bounds = array<i64: 2, 128, 128>}, {pipeline_mode = #tpu.pipeline_mode<synchronous>, transform_indices = @transform_4, window_bounds = array<i64: 2, 1, 128>}, {pipeline_mode = #tpu.pipeline_mode<synchronous>, transform_indices = @transform_5, window_bounds = array<i64: 128, 8>}, {pipeline_mode = #tpu.pipeline_mode<synchronous>, transform_indices = @transform_6, window_bounds = array<i64: 1, 8>}, {transform_indices = @transform_7, window_bounds = array<i64: 8, 8>}]} {
    %c0 = arith.constant 0 : index
    %c0_0 = arith.constant 0 : index
    %0 = vector.load %arg1[%c0, %c0_0] : memref<8x8xf32, #tpu.memory_space<vmem>>, vector<8x8xf32>
    %c0_1 = arith.constant 0 : index
    %c0_2 = arith.constant 0 : index
    %1 = vector.load %arg2[%c0_1, %c0_2] : memref<8x128xf32, #tpu.memory_space<vmem>>, vector<8x128xf32>
    %c0_3 = arith.constant 0 : index
    %c0_4 = arith.constant 0 : index
    %2 = vector.load %arg3[%c0_3, %c0_4] : memref<1x128xf32, #tpu.memory_space<vmem>>, vector<1x128xf32>
    %3 = vector.extract_strided_slice %0 {offsets = [0, 0], sizes = [8, 1], strides = [1, 1]} : vector<8x8xf32> to vector<8x1xf32>
    %4 = vector.extract_strided_slice %1 {offsets = [0, 0], sizes = [1, 128], strides = [1, 1]} : vector<8x128xf32> to vector<1x128xf32>
    %5 = vector.broadcast %3 : vector<8x1xf32> to vector<8x128xf32>
    %6 = vector.broadcast %4 : vector<1x128xf32> to vector<8x128xf32>
    %7 = arith.mulf %5, %6 : vector<8x128xf32>
    %8 = vector.broadcast %2 : vector<1x128xf32> to vector<8x128xf32>
    %9 = arith.addf %8, %7 : vector<8x128xf32>
    %10 = vector.extract_strided_slice %0 {offsets = [0, 1], sizes = [8, 1], strides = [1, 1]} : vector<8x8xf32> to vector<8x1xf32>
    %11 = vector.extract_strided_slice %1 {offsets = [1, 0], sizes = [1, 128], strides = [1, 1]} : vector<8x128xf32> to vector<1x128xf32>
    %12 = vector.broadcast %10 : vector<8x1xf32> to vector<8x128xf32>
    %13 = vector.broadcast %11 : vector<1x128xf32> to vector<8x128xf32>
    %14 = arith.mulf %12, %13 : vector<8x128xf32>
    %15 = arith.addf %9, %14 : vector<8x128xf32>
    %16 = vector.extract_strided_slice %0 {offsets = [0, 2], sizes = [8, 1], strides = [1, 1]} : vector<8x8xf32> to vector<8x1xf32>
    %17 = vector.extract_strided_slice %1 {offsets = [2, 0], sizes = [1, 128], strides = [1, 1]} : vector<8x128xf32> to vector<1x128xf32>
    %18 = vector.broadcast %16 : vector<8x1xf32> to vector<8x128xf32>
    %19 = vector.broadcast %17 : vector<1x128xf32> to vector<8x128xf32>
    %20 = arith.mulf %18, %19 : vector<8x128xf32>
    %21 = arith.addf %15, %20 : vector<8x128xf32>
    %22 = vector.extract_strided_slice %0 {offsets = [0, 3], sizes = [8, 1], strides = [1, 1]} : vector<8x8xf32> to vector<8x1xf32>
    %23 = vector.extract_strided_slice %1 {offsets = [3, 0], sizes = [1, 128], strides = [1, 1]} : vector<8x128xf32> to vector<1x128xf32>
    %24 = vector.broadcast %22 : vector<8x1xf32> to vector<8x128xf32>
    %25 = vector.broadcast %23 : vector<1x128xf32> to vector<8x128xf32>
    %26 = arith.mulf %24, %25 : vector<8x128xf32>
    %27 = arith.addf %21, %26 : vector<8x128xf32>
    %28 = vector.extract_strided_slice %0 {offsets = [0, 4], sizes = [8, 1], strides = [1, 1]} : vector<8x8xf32> to vector<8x1xf32>
    %29 = vector.extract_strided_slice %1 {offsets = [4, 0], sizes = [1, 128], strides = [1, 1]} : vector<8x128xf32> to vector<1x128xf32>
    %30 = vector.broadcast %28 : vector<8x1xf32> to vector<8x128xf32>
    %31 = vector.broadcast %29 : vector<1x128xf32> to vector<8x128xf32>
    %32 = arith.mulf %30, %31 : vector<8x128xf32>
    %33 = arith.addf %27, %32 : vector<8x128xf32>
    %34 = vector.extract_strided_slice %0 {offsets = [0, 5], sizes = [8, 1], strides = [1, 1]} : vector<8x8xf32> to vector<8x1xf32>
    %35 = vector.extract_strided_slice %1 {offsets = [5, 0], sizes = [1, 128], strides = [1, 1]} : vector<8x128xf32> to vector<1x128xf32>
    %36 = vector.broadcast %34 : vector<8x1xf32> to vector<8x128xf32>
    %37 = vector.broadcast %35 : vector<1x128xf32> to vector<8x128xf32>
    %38 = arith.mulf %36, %37 : vector<8x128xf32>
    %39 = arith.addf %33, %38 : vector<8x128xf32>
    %40 = vector.extract_strided_slice %0 {offsets = [0, 6], sizes = [8, 1], strides = [1, 1]} : vector<8x8xf32> to vector<8x1xf32>
    %41 = vector.extract_strided_slice %1 {offsets = [6, 0], sizes = [1, 128], strides = [1, 1]} : vector<8x128xf32> to vector<1x128xf32>
    %42 = vector.broadcast %40 : vector<8x1xf32> to vector<8x128xf32>
    %43 = vector.broadcast %41 : vector<1x128xf32> to vector<8x128xf32>
    %44 = arith.mulf %42, %43 : vector<8x128xf32>
    %45 = arith.addf %39, %44 : vector<8x128xf32>
    %46 = vector.extract_strided_slice %0 {offsets = [0, 7], sizes = [8, 1], strides = [1, 1]} : vector<8x8xf32> to vector<8x1xf32>
    %47 = vector.extract_strided_slice %1 {offsets = [7, 0], sizes = [1, 128], strides = [1, 1]} : vector<8x128xf32> to vector<1x128xf32>
    %48 = vector.broadcast %46 : vector<8x1xf32> to vector<8x128xf32>
    %49 = vector.broadcast %47 : vector<1x128xf32> to vector<8x128xf32>
    %50 = arith.mulf %48, %49 : vector<8x128xf32>
    %51 = arith.addf %45, %50 : vector<8x128xf32>
    %52 = math.tanh %51 : vector<8x128xf32>
    %c0_5 = arith.constant 0 : index
    %c0_6 = arith.constant 0 : index
    %c0_7 = arith.constant 0 : index
    %53 = vector.load %arg4[%c0_5, %c0_6, %c0_7] : memref<2x128x128xf32, #tpu.memory_space<vmem>>, vector<1x128x128xf32>
    %54 = vector.shape_cast %53 : vector<1x128x128xf32> to vector<128x128xf32>
    %cst = arith.constant dense<0.000000e+00> : vector<8x128xf32>
    %55 = tpu.matmul %52, %54, %cst {dimension_numbers = #tpu.dot_dimension_numbers<[1], [0], [0], [1], [0, 0, 1, 1], [], []>} : vector<8x128xf32>, vector<128x128xf32>, vector<8x128xf32> -> vector<8x128xf32>
    %c0_8 = arith.constant 0 : index
    %c0_9 = arith.constant 0 : index
    %c0_10 = arith.constant 0 : index
    %56 = vector.load %arg5[%c0_8, %c0_9, %c0_10] : memref<2x1x128xf32, #tpu.memory_space<vmem>>, vector<1x1x128xf32>
    %57 = vector.shape_cast %56 : vector<1x1x128xf32> to vector<1x128xf32>
    %58 = vector.broadcast %57 : vector<1x128xf32> to vector<8x128xf32>
    %59 = arith.addf %55, %58 : vector<8x128xf32>
    %60 = math.tanh %59 : vector<8x128xf32>
    %c1 = arith.constant 1 : index
    %c0_11 = arith.constant 0 : index
    %c0_12 = arith.constant 0 : index
    %61 = vector.load %arg4[%c1, %c0_11, %c0_12] : memref<2x128x128xf32, #tpu.memory_space<vmem>>, vector<1x128x128xf32>
    %62 = vector.shape_cast %61 : vector<1x128x128xf32> to vector<128x128xf32>
    %cst_13 = arith.constant dense<0.000000e+00> : vector<8x128xf32>
    %63 = tpu.matmul %60, %62, %cst_13 {dimension_numbers = #tpu.dot_dimension_numbers<[1], [0], [0], [1], [0, 0, 1, 1], [], []>} : vector<8x128xf32>, vector<128x128xf32>, vector<8x128xf32> -> vector<8x128xf32>
    %c1_14 = arith.constant 1 : index
    %c0_15 = arith.constant 0 : index
    %c0_16 = arith.constant 0 : index
    %64 = vector.load %arg5[%c1_14, %c0_15, %c0_16] : memref<2x1x128xf32, #tpu.memory_space<vmem>>, vector<1x1x128xf32>
    %65 = vector.shape_cast %64 : vector<1x1x128xf32> to vector<1x128xf32>
    %66 = vector.broadcast %65 : vector<1x128xf32> to vector<8x128xf32>
    %67 = arith.addf %63, %66 : vector<8x128xf32>
    %68 = math.tanh %67 : vector<8x128xf32>
    %c0_17 = arith.constant 0 : index
    %c0_18 = arith.constant 0 : index
    %69 = vector.load %arg6[%c0_17, %c0_18] : memref<128x8xf32, #tpu.memory_space<vmem>>, vector<128x8xf32>
    %cst_19 = arith.constant dense<0.000000e+00> : vector<8x8xf32>
    %70 = tpu.matmul %68, %69, %cst_19 {dimension_numbers = #tpu.dot_dimension_numbers<[1], [0], [0], [1], [0, 0, 1, 1], [], []>} : vector<8x128xf32>, vector<128x8xf32>, vector<8x8xf32> -> vector<8x8xf32>
    %c0_20 = arith.constant 0 : index
    %c0_21 = arith.constant 0 : index
    %71 = vector.load %arg7[%c0_20, %c0_21] : memref<1x8xf32, #tpu.memory_space<vmem>>, vector<1x8xf32>
    %72 = vector.broadcast %71 : vector<1x8xf32> to vector<8x8xf32>
    %73 = arith.addf %70, %72 : vector<8x8xf32>
    %c0_22 = arith.constant 0 : index
    %c0_23 = arith.constant 0 : index
    %74 = vector.load %arg8[%c0_22, %c0_23] : memref<8x8xf32, #tpu.memory_space<vmem>>, vector<8x8xf32>
    tpu.vector_store %arg8[%c0_22, %c0_23], %73 {strides = array<i32>} : memref<8x8xf32, #tpu.memory_space<vmem>>, vector<8x8xf32>,
    return
  }
  func.func @transform_0(%arg0: i32) -> (i32, i32) {
    %c0_i32 = arith.constant 0 : i32
    %c0_i32_0 = arith.constant 0 : i32
    return %arg0, %c0_i32 : i32, i32
  }
  func.func @transform_1(%arg0: i32) -> (i32, i32) {
    %c0_i32 = arith.constant 0 : i32
    %c0_i32_0 = arith.constant 0 : i32
    %c0_i32_1 = arith.constant 0 : i32
    return %c0_i32, %c0_i32_0 : i32, i32
  }
  func.func @transform_2(%arg0: i32) -> (i32, i32) {
    %c0_i32 = arith.constant 0 : i32
    %c0_i32_0 = arith.constant 0 : i32
    %c0_i32_1 = arith.constant 0 : i32
    return %c0_i32, %c0_i32_0 : i32, i32
  }
  func.func @transform_3(%arg0: i32) -> (i32, i32, i32) {
    %c0_i32 = arith.constant 0 : i32
    %c0_i32_0 = arith.constant 0 : i32
    %c0_i32_1 = arith.constant 0 : i32
    %c0_i32_2 = arith.constant 0 : i32
    return %c0_i32, %c0_i32_0, %c0_i32_1 : i32, i32, i32
  }
  func.func @transform_4(%arg0: i32) -> (i32, i32, i32) {
    %c0_i32 = arith.constant 0 : i32
    %c0_i32_0 = arith.constant 0 : i32
    %c0_i32_1 = arith.constant 0 : i32
    %c0_i32_2 = arith.constant 0 : i32
    return %c0_i32, %c0_i32_0, %c0_i32_1 : i32, i32, i32
  }
  func.func @transform_5(%arg0: i32) -> (i32, i32) {
    %c0_i32 = arith.constant 0 : i32
    %c0_i32_0 = arith.constant 0 : i32
    %c0_i32_1 = arith.constant 0 : i32
    return %c0_i32, %c0_i32_0 : i32, i32
  }
  func.func @transform_6(%arg0: i32) -> (i32, i32) {
    %c0_i32 = arith.constant 0 : i32
    %c0_i32_0 = arith.constant 0 : i32
    %c0_i32_1 = arith.constant 0 : i32
    return %c0_i32, %c0_i32_0 : i32, i32
  }
  func.func @transform_7(%arg0: i32) -> (i32, i32) {
    %c0_i32 = arith.constant 0 : i32
    %c0_i32_0 = arith.constant 0 : i32
    return %arg0, %c0_i32 : i32, i32
  }
}

</mosaic_0001>

<bundles_post_ra>
// kernel: tpu_custom_call.1
= control target key start
LH: loop header
LB: loop body
LE: loop exit
PB: predicated region body
PF: predicated region fallthrough
CT: control target
= control target key end

     0   :  { %12 = vsyncpa [#allocation3], 0  ;;  %s1115_s24 = smov 0   ;;  %s1271_s0 = inlined_call_operand.vmem [shape: f32[16,8], index: 0, kind: input, shape index: {}]   ;;  %s1272_s1 = inlined_call_operand.vmem [shape: f32[8,128], index: 1, kind: input, shape index: {}]   ;;  %s1273_s2 = inlined_call_operand.vmem [shape: f32[1,128], index: 2, kind: input, shape index: {}]   ;;  %s1274_s3 = inlined_call_operand.hbm [shape: f32[2,128,128], index: 3, kind: input, shape index: {}]   ;;  %s1275_s4 = inlined_call_operand.vmem [shape: f32[2,1,128], index: 4, kind: input, shape index: {}]   ;;  %s1276_s5 = inlined_call_operand.vmem [shape: f32[128,8], index: 5, kind: input, shape index: {}]   ;;  %s1277_s6 = inlined_call_operand.vmem [shape: f32[1,8], index: 6, kind: input, shape index: {}]   ;;  %s1278_s7 = inlined_call_operand.vmem [shape: f32[16,8], index: 7, kind: output, shape index: {}]  }
   0x1 LB: > { %s1121_s25 = sadd.s32 4294967295, %s1059_s24   ;;  %p732_p0 = scmp.ge.s32.totalorder %s1059_s24, 1  ;;  %s1059_s24 = sphi %s1115_s24, %s18_s24  }
   0x2   : > { %p201_p1 = scmp.lt.s32.totalorder %s1059_s24, 3  ;;  %s1061_s26 = smov [#allocation2]  }
   0x3   : > { %s219_s27 = sshll.u32 %s1061_s26, 4  ;;  %p1279_p3 = scmp.eq.s32.totalorder %s1121_s25, 0  ;;  %s220_s27 = int_to_ptr.vmem [resolvable:$true] %s219_s27 }
   0x4   : > { %p1125_p2 = pnand %p732_p0, %p201_p1  ;;  %s1021_s9 = scalar_lea.hbm %s1274_s3, 4096 }
   0x5   : > { %p1022_p6 = scmp.ne.s32.totalorder %s1274_s3, %s1021_s9  ;;  %p1028_p10 = scmp.lt.u32.totalorder %s1021_s9, %s1274_s3 }
   0x6   : > { %s1281_s28 = scalar_select %p1125_p2, 1, 0 }
   0x7   : > { %p978_p4 = pneg %p1125_p2 }
   0x9   : > { %p1134_p5 = pnand %p1279_p3, %p978_p4 }
   0xb   : > { %p1023_p7 = pneg %p1134_p5 }
   0xd   : > { %p1024_p8 = pnand %p1023_p7, %p1022_p6 }
   0xf   : > { %p1025_p9 = pneg %p1024_p8 }
  0x11   : > { %p1030_p11 = pnand %p1028_p10, %p1025_p9 }
  0x13   : > { %1033 = shalt.err (!%p1030_p11)
}
  0x14   : > { %s1034_s14 = scalar_lea.vmem %s220_s27, 4096  ;;  %p1042_p1 = scmp.lt.s32.totalorder %s220_s27, %s220_s27 }
  0x15   : > { %p1035_p12 = scmp.ne.s32.totalorder %s220_s27, %s1034_s14  ;;  %p1043_p4 = scmp.lt.s32.totalorder %s1034_s14, %s1034_s14 }
  0x17   : > { %p1037_p13 = pnand %p1035_p12, %p1023_p7  ;;  %p1044_p3 = por %p1043_p4, %p1042_p1 }
  0x19   : > { %p1038_p0 = pneg %p1037_p13 }
  0x1b   : > { %p1045_p2 = pnand %p1044_p3, %p1038_p0 }
  0x1d   : > { %1048 = shalt.err (!%p1045_p2)
}
  0x1e   : > { %s1062_s15 = smov 128   ;;  %s1063_s16 = smov 8  }
  0x1f   : > { %981 = dma.hbm_to_vmem [thread:$0]  (!%p1134_p5), %s1274_s3, 4096, %s220_s27, [#allocation3], %s1062_s15, %s1062_s15, %s1063_s16  }
  0x20   : > { %p1283_p6 = scmp.ne.s32.totalorder %s1281_s28, 0 }
  0x21   : > { %p1284_p8 = scmp.eq.s32.totalorder (!%p1283_p6), %s1121_s25, 0 }
  0x22   : > { %251 = sbr.rel (%p1283_p6) target bundleno = 876 (0x36c), region = 48 }
  0x29   : > { %1054 = dma.done.wait (%p1284_p8), [#allocation3], 4096   ;;  %p1285_p7 = pmov %p1284_p8 }
  0x2a   : > { %p281_p2 = scmp.lt.s32.totalorder %s1121_s25, 1  ;;  %v1064_v0 = vmov 2   ;;  %v1065_v1 = vmov 0   ;;  %v380_v3 = vld [vmem:[#allocation2] sm:$0xff]  ;;  %v381_v4 = vld [vmem:[#allocation2 + $0x8] sm:$0xff]  ;;  %v1066_v6 = vmov 0.0|0.0   ;;  %v297_v50 = vlaneseq }
  0x2b   : > { %1056 = vsyncadd (%p1285_p7), [#allocation3], 4294963200  ;;  %1008 = vset.pattern.permute.xlu1 %v1064_v0  ;;  %1006 = vset.pattern.permute.xlu0 %v1065_v1  ;;  %v903_v5 = vpack.c.bf16 %v381_v4, %v380_v3  ;;  %v1067_v7 = vmov 3   ;;  %v1068_v8 = vmov 1   ;;  %v382_v9 = vld [vmem:[#allocation2 + $0x10] sm:$0xff]  ;;  %v383_v10 = vld [vmem:[#allocation2 + $0x18] sm:$0xff] }
  0x2c   : > { %s1287_s25 = smov (!%p281_p2, %s1121_s25), 1  ;;  %902 = vmatprep.subr.bf16.mxu0 %v1066_v6  ;;  %926 = vmatprep.subr.bf16.mxu1 %v1066_v6  ;;  %v906_v11 = vpack.c.bf16 %v383_v10, %v382_v9  ;;  %v1069_v12 = vmov 4   ;;  %v1070_v13 = vmov 5   ;;  %v384_v14 = vld [vmem:[#allocation2 + $0x20] sm:$0xff]  ;;  %v385_v15 = vld [vmem:[#allocation2 + $0x28] sm:$0xff]  ;;  %v386_v17 = vld [vmem:[#allocation2 + $0x30] sm:$0xff] }
  0x2d   : > { %s737_s19 = sshll.u32 %s1287_s25, 3  ;;  %904 = vmatpush3.bf16.msra.mxu0 %v903_v5  ;;  %v909_v16 = vpack.c.bf16 %v385_v15, %v384_v14  ;;  %v387_v18 = vld [vmem:[#allocation2 + $0x38] sm:$0xff]  ;;  %v1071_v19 = vmov 6   ;;  %v1072_v20 = vmov 7   ;;  %v388_v22 = vld [vmem:[#allocation2 + $0x40] sm:$0xff]  ;;  %v389_v23 = vld [vmem:[#allocation2 + $0x48] sm:$0xff] }
  0x2e   : > { %s284_s22 = scalar_lea.vmem %s1271_s0, %s737_s19  ;;  %905 = vmatprep.subr.bf16.mxu0 %v1066_v6  ;;  %v912_v21 = vpack.c.bf16 %v387_v18, %v386_v17  ;;  %v915_v24 = vpack.c.bf16 %v389_v23, %v388_v22  ;;  %v390_v25 = vld [vmem:[#allocation2 + $0x50] sm:$0xff]  ;;  %v391_v26 = vld [vmem:[#allocation2 + $0x58] sm:$0xff]  ;;  %v392_v28 = vld [vmem:[#allocation2 + $0x60] sm:$0xff]  ;;  %vm1073_vm0 = vmmov 0   ;;  %v1074_v30 = vmov 0.0   ;;  %s288_s29 = scalar_lea.vmem %s1278_s7, %s737_s19 }
  0x2f   : > { %v289_v2 = vld [vmem:[%s284_s22] sm:$0xff]  ;;  %v918_v27 = vpack.c.bf16 %v391_v26, %v390_v25  ;;  %v393_v29 = vld [vmem:[#allocation2 + $0x68] sm:$0xff]  ;;  %829 = vmatprep.mubr.msk.f32.mxu0 %vm1073_vm0, %v1074_v30  ;;  %864 = vmatprep.mubr.msk.f32.mxu1 %vm1073_vm0, %v1074_v30  ;;  %v394_v32 = vld [vmem:[#allocation2 + $0x70] sm:$0xff]  ;;  %v298_v51 = vshrl.u32 %v297_v50, 7  ;;  %vm663_vm1 = vcmask 64512  }
  0x30   : > { %320 = vperm.xlu1 %1008, %v289_v2   ;;  %294 = vperm.xlu0 %1006, %v289_v2   ;;  %v921_v31 = vpack.c.bf16 %v393_v29, %v392_v28  ;;  %v395_v33 = vld [vmem:[#allocation2 + $0x78] sm:$0xff]  ;;  %v475_v35 = vld [vmem:[#allocation2 + $0x80] sm:$0xff]  ;;  %v476_v36 = vld [vmem:[#allocation2 + $0x88] sm:$0xff] }
  0x31   : > { %907 = vmatpush3.bf16.msra.mxu0 %v906_v11  ;;  %v924_v34 = vpack.c.bf16 %v395_v33, %v394_v32  ;;  %v477_v37 = vld [vmem:[#allocation2 + $0x90] sm:$0xff]  ;;  %v927_v38 = vpack.c.bf16 %v476_v36, %v475_v35  ;;  %v478_v39 = vld [vmem:[#allocation2 + $0x98] sm:$0xff]  ;;  %v479_v41 = vld [vmem:[#allocation2 + $0xa0] sm:$0xff]  ;;  %v299_v52 = vsub.s32 0, %v298_v51  ;;  %v315_v55 = vsub.s32 1, %v298_v51 }
  0x32   : > { %908 = vmatprep.subr.bf16.mxu0 %v1066_v6  ;;  %v930_v40 = vpack.c.bf16 %v478_v39, %v477_v37  ;;  %v480_v42 = vld [vmem:[#allocation2 + $0xa8] sm:$0xff]  ;;  %v481_v44 = vld [vmem:[#allocation2 + $0xb0] sm:$0xff]  ;;  %v482_v45 = vld [vmem:[#allocation2 + $0xb8] sm:$0xff]  ;;  %v325_v56 = vsub.s32 2, %v298_v51  ;;  %v335_v61 = vsub.s32 3, %v298_v51  ;;  %v345_v63 = vsub.s32 4, %v298_v51 }
  0x33   : > { %928 = vmatpush3.bf16.msra.mxu1 %v927_v38  ;;  %v933_v43 = vpack.c.bf16 %v480_v42, %v479_v41  ;;  %v936_v46 = vpack.c.bf16 %v482_v45, %v481_v44  ;;  %v483_v47 = vld [vmem:[#allocation2 + $0xc0] sm:$0xff]  ;;  %v484_v48 = vld [vmem:[#allocation2 + $0xc8] sm:$0xff]  ;;  %v355_v4 = vsub.s32 5, %v298_v51  ;;  %v485_v33 = vld [vmem:[#allocation2 + $0xd0] sm:$0xff] }
  0x34   : > { %1009 = vset.pattern.permute.xlu1 %v1067_v7  ;;  %1007 = vset.pattern.permute.xlu0 %v1068_v8  ;;  %v939_v49 = vpack.c.bf16 %v484_v48, %v483_v47  ;;  %v290_v53 = vld [vmem:[%s1272_s1] sm:$0xff]  ;;  %v488_v37 = vld [vmem:[#allocation2 + $0xe8] sm:$0xff]  ;;  %v489_v39 = vld [vmem:[#allocation2 + $0xf0] sm:$0xff] }
  0x35   : > { %330 = vperm.xlu1 %1009, %v289_v2   ;;  %310 = vperm.xlu0 %1007, %v289_v2   ;;  %v300_v54 = vrot.slane %v290_v53, %v299_v52  ;;  %v739_v59 = vld [vmem:[%s1273_s2] ss:$0 sm:$0xff]  ;;  %v316_v62 = vrot.slane %v290_v53, %v315_v55  ;;  %v326_v0 = vrot.slane %v290_v53, %v325_v56  ;;  %v571_v42 = vld [vmem:[%s1276_s5 + $0x8] sm:$0xff]  ;;  %v573_v45 = vld [vmem:[%s1276_s5 + $0x18] sm:$0xff] }
  0x36   : > { %910 = vmatpush3.bf16.msra.mxu0 %v909_v16  ;;  %929 = vmatprep.subr.bf16.mxu1 %v1066_v6  ;;  %v336_v5 = vrot.slane %v290_v53, %v335_v61  ;;  %v346_v8 = vrot.slane %v290_v53, %v345_v63  ;;  %v356_v11 = vrot.slane %v290_v53, %v355_v4  ;;  %v487_v36 = vld [vmem:[#allocation2 + $0xe0] sm:$0xff]  ;;  %v575_v48 = vld [vmem:[%s1276_s5 + $0x28] sm:$0xff]  ;;  %v576_v50 = vld [vmem:[%s1276_s5 + $0x30] sm:$0xff] }
  0x37   : > { %911 = vmatprep.subr.bf16.mxu0 %v1066_v6  ;;  %931 = vmatpush3.bf16.msra.mxu1 %v930_v40  ;;  %v945_v38 = vpack.c.bf16 %v488_v37, %v487_v36  ;;  %v490_v40 = vld [vmem:[#allocation2 + $0xf8] sm:$0xff]  ;;  %v574_v47 = vld [vmem:[%s1276_s5 + $0x20] sm:$0xff]  ;;  %v580_v61 = vld [vmem:[%s1276_s5 + $0x50] sm:$0xff] }
  0x38   : > { %932 = vmatprep.subr.bf16.mxu1 %v1066_v6  ;;  %v948_v41 = vpack.c.bf16 %v490_v40, %v489_v39  ;;  %v740_v56 = vld [vmem:[%s1275_s4] ss:$0 sm:$0xff]  ;;  %v585_v4 = vld [vmem:[%s1276_s5 + $0x78] sm:$0xff] }
  0x39   : > { %1010 = vset.pattern.permute.xlu1 %v1069_v12  ;;  %1011 = vset.pattern.permute.xlu0 %v1070_v13  ;;  %v365_v12 = vsub.s32 6, %v298_v51 }
  0x3a   : > { %340 = vperm.xlu1 %1010, %v289_v2   ;;  %350 = vperm.xlu0 %1011, %v289_v2  }
  0x3b   : > { %913 = vmatpush3.bf16.msra.mxu0 %v912_v21  ;;  %934 = vmatpush3.bf16.msra.mxu1 %v933_v43  ;;  %v375_v21 = vsub.s32 7, %v298_v51  ;;  %v572_v43 = vld [vmem:[%s1276_s5 + $0x10] sm:$0xff]  ;;  %v577_v51 = vld [vmem:[%s1276_s5 + $0x38] sm:$0xff] }
  0x3c   : > { %914 = vmatprep.subr.bf16.mxu0 %v1066_v6  ;;  %935 = vmatprep.subr.bf16.mxu1 %v1066_v6  ;;  %v960_v52 = vpack.c.bf16 %v577_v51, %v576_v50 }
  0x3d   : > { %v376_v26 = vrot.slane %v290_v53, %v375_v21 }
  0x3e   : > { %1012 = vset.pattern.permute.xlu1 %v1071_v19  ;;  %1014 = vset.pattern.permute.xlu0 %v1072_v20 }
  0x3f   : > { %360 = vperm.xlu1 %1012, %v289_v2   ;;  %916 = vmatpush3.bf16.msra.mxu0 %v915_v24 }
  0x40   : > { %917 = vmatprep.subr.bf16.mxu0 %v1066_v6  ;;  %937 = vmatpush3.bf16.msra.mxu1 %v936_v46  ;;  %v954_v46 = vpack.c.bf16 %v573_v45, %v572_v43 }
  0x41   : > { %938 = vmatprep.subr.bf16.mxu1 %v1066_v6 }
  0x43   : > { %1013 = vset.pattern.permute.xlu1 %v1072_v20  ;;  %919 = vmatpush3.bf16.msra.mxu0 %v918_v27  ;;  %v366_v20 = vrot.slane %v290_v53, %v365_v12  ;;  %v578_v53 = vld [vmem:[%s1276_s5 + $0x40] sm:$0xff] }
  0x44   : > { %370 = vperm.xlu1 %1013, %v289_v2   ;;  %920 = vmatprep.subr.bf16.mxu0 %v1066_v6  ;;  %v743_v12 = vld [vmem:[%s1277_s6] ss:$0 sm:$0xff] }
  0x45   : > { %940 = vmatpush3.bf16.msra.mxu1 %v939_v49  ;;  %v957_v49 = vpack.c.bf16 %v575_v48, %v574_v47 }
  0x46   : > { %941 = vmatprep.subr.bf16.mxu1 %v1066_v6 }
  0x47   : > { %922 = vmatpush3.bf16.msra.mxu0 %v921_v31 }
  0x48   : > { %923 = vmatprep.subr.bf16.mxu0 %v1066_v6 }
  0x4b   : > { %925 = vmatpush3.bf16.msra.mxu0 %v924_v34  ;;  %v486_v34 = vld [vmem:[#allocation2 + $0xd8] sm:$0xff] }
  0x4c   : > { %950 = vmatprep.subr.bf16.mxu0 %v1066_v6  ;;  %v942_v35 = vpack.c.bf16 %v486_v34, %v485_v33 }
  0x4e   : > { %943 = vmatpush3.bf16.msra.mxu1 %v942_v35 }
  0x4f   : > { %944 = vmatprep.subr.bf16.mxu1 %v1066_v6 }
  0x52   : > { %946 = vmatpush3.bf16.msra.mxu1 %v945_v38 }
  0x53   : > { %947 = vmatprep.subr.bf16.mxu1 %v1066_v6 }
  0x56   : > { %949 = vmatpush3.bf16.msra.mxu1 %v948_v41 }
  0xaf   : > { %v321_v57 = vpop.permute.xlu1 %320  ;;  %v295_v58 = vpop.permute.xlu0 %294 }
  0xb0   : > { %v301_v60 = vmul.f32 %v300_v54, %v295_v58  ;;  %v327_v9 = vmul.f32 %v326_v0, %v321_v57  ;;  %v579_v54 = vld [vmem:[%s1276_s5 + $0x48] sm:$0xff]  ;;  %v582_v0 = vld [vmem:[%s1276_s5 + $0x60] sm:$0xff] }
  0xb1   : > { %v963_v55 = vpack.c.bf16 %v579_v54, %v578_v53 }
  0xb2   : > { %v308_v1 = vadd.f32 %v739_v59, %v301_v60 }
  0xb4   : > { %v331_v2 = vpop.permute.xlu1 %330  ;;  %v311_v3 = vpop.permute.xlu0 %310 }
  0xb5   : > { %v317_v7 = vmul.f32 %v316_v62, %v311_v3  ;;  %v337_v13 = vmul.f32 %v336_v5, %v331_v2  ;;  %v581_v62 = vld [vmem:[%s1276_s5 + $0x58] sm:$0xff]  ;;  %v584_v3 = vld [vmem:[%s1276_s5 + $0x70] sm:$0xff] }
  0xb6   : > { %v966_v63 = vpack.c.bf16 %v581_v62, %v580_v61  ;;  %v972_v5 = vpack.c.bf16 %v585_v4, %v584_v3 }
  0xb7   : > { %v318_v10 = vadd.f32 %v317_v7, %v308_v1  ;;  %v583_v1 = vld [vmem:[%s1276_s5 + $0x68] sm:$0xff]  ;;  %v742_v7 = vld [vmem:[%s1275_s4 + $0x1] ss:$0 sm:$0xff] }
  0xb8   : > { %v969_v2 = vpack.c.bf16 %v583_v1, %v582_v0 }
  0xb9   : > { %v328_v14 = vadd.f32 %v327_v9, %v318_v10  ;;  %v341_v15 = vpop.permute.xlu1 %340  ;;  %v351_v16 = vpop.permute.xlu0 %350 }
  0xba   : > { %v347_v17 = vmul.f32 %v346_v8, %v341_v15  ;;  %v357_v19 = vmul.f32 %v356_v11, %v351_v16 }
  0xbb   : > { %v338_v18 = vadd.f32 %v337_v13, %v328_v14 }
  0xbd   : > { %v348_v22 = vadd.f32 %v347_v17, %v338_v18 }
  0xbe   : > { %v361_v23 = vpop.permute.xlu1 %360 }
  0xbf   : > { %v358_v24 = vadd.f32 %v357_v19, %v348_v22  ;;  %v367_v25 = vmul.f32 %v366_v20, %v361_v23 }
  0xc1   : > { %v368_v28 = vadd.f32 %v367_v25, %v358_v24 }
  0xc3   : > { %v371_v27 = vpop.permute.xlu1 %370 }
  0xc4   : > { %v377_v29 = vmul.f32 %v376_v26, %v371_v27 }
  0xc6   : > { %v378_v31 = vadd.f32 %v377_v29, %v368_v28 }
  0xc8   : > { %1015 = vtanh.f32 %v378_v31 }
  0xd2   : > { %v1016_v32 = vpop.eup %1015 }
  0xd3   : > { %830 = vmatmul.mubr.f32.vlgmr.msra.gmra.mrb[0].mxu0 %v1016_v32 }
  0xd4   : > { %899 = vmatprep.mubr.msk.f32.mxu0 %vm1073_vm0, %v1074_v30  ;;  %v570_v30 = vld [vmem:[%s1276_s5] sm:$0xff] }
  0xd5   : > { %v951_v44 = vpack.c.bf16 %v571_v42, %v570_v30 }
  0xd7   : > { %952 = vmatpush3.bf16.msra.mxu0 %v951_v44 }
  0xd8   : > { %953 = vmatprep.subr.bf16.mxu0 %v1066_v6 }
  0xdb   : > { %955 = vmatpush3.bf16.msra.mxu0 %v954_v46 }
  0xdc   : > { %956 = vmatprep.subr.bf16.mxu0 %v1066_v6 }
  0xdf   : > { %958 = vmatpush3.bf16.msra.mxu0 %v957_v49 }
  0xe0   : > { %959 = vmatprep.subr.bf16.mxu0 %v1066_v6 }
  0xe3   : > { %961 = vmatpush3.bf16.msra.mxu0 %v960_v52 }
  0xe4   : > { %962 = vmatprep.subr.bf16.mxu0 %v1066_v6 }
  0xe7   : > { %964 = vmatpush3.bf16.msra.mxu0 %v963_v55 }
  0xe8   : > { %965 = vmatprep.subr.bf16.mxu0 %v1066_v6 }
  0xeb   : > { %967 = vmatpush3.bf16.msra.mxu0 %v966_v63 }
  0xec   : > { %968 = vmatprep.subr.bf16.mxu0 %v1066_v6 }
  0xef   : > { %970 = vmatpush3.bf16.msra.mxu0 %v969_v2 }
  0xf0   : > { %971 = vmatprep.subr.bf16.mxu0 %v1066_v6 }
  0xf3   : > { %973 = vmatpush3.bf16.msra.mxu0 %v972_v5 }
 0x1a6   : > { %v469_v57 = vpop.f32.mrb[0].mxu0 }
 0x1a7   : > { %v470_v58 = vadd.f32 %v740_v56, %v469_v57  ;;  %v831_v59 = vpop.f32.mrb[1].mxu0 }
 0x1a9   : > { %1017 = vtanh.f32 %v470_v58 }
 0x1b3   : > { %v1018_v60 = vpop.eup %1017 }
 0x1b4   : > { %865 = vmatmul.mubr.f32.vlgmr.msra.gmra.mrb[0].mxu1 %v1018_v60 }
 0x287   : > { %v565_v8 = vpop.f32.mrb[0].mxu1 }
 0x288   : > { %v566_v9 = vadd.f32 %v742_v7, %v565_v8  ;;  %v866_v10 = vpop.f32.mrb[1].mxu1 }
 0x28a   : > { %1019 = vtanh.f32 %v566_v9 }
 0x294   : > { %v1020_v11 = vpop.eup %1019 }
 0x295   : > { %900 = vmatmul.mubr.f32.vlgmr.msra.gmra.mrb[2].mxu0 %v1020_v11 }
 0x368   : > { %v659_v6 = vpop.f32.mrb[2].mxu0 }
 0x369   : > { %v660_v13 = vadd.f32 %v743_v12, %v659_v6  ;;  %v901_v14 = vpop.f32.mrb[3].mxu0 }
 0x36b   : > { %664 = vst.msk [vmem:[%s288_s29] sm:$0xff] %vm663_vm1, %v660_v13 }
 0x36c PF: > { %s18_s24 = sadd.s32 1, %s1059_s24  }
 0x36d   : > { %p15_p3 = scmp.ge.s32.totalorder %s18_s24, 4  }
 0x36f   :  { %17 = sbr.rel (!%p15_p3) target bundleno = 1 (0x1), region = 85 }
 0x376   :  { %684 = vsyncpa [#allocation3], 1 }
 0x377   :  { %686 = vsyncpa [#allocation3 + $0x1], 1 }

</bundles_post_ra>
